<compile_context>
chip_gen: v7x
topology: tpu7x:2x2x1
jax: 0.10.0
libtpu: 0.0.40
codegen_flags: <defaults>
</compile_context>

<pallas_src>
import functools

import numpy as np
import jax
import jax.numpy as jnp
from jax.experimental import pallas as pl
from jax.experimental.pallas import tpu as pltpu


# ---------------------------------------------------------------------------
# Pooling matrix (host-side, cached per (length, output_length))
# ---------------------------------------------------------------------------
@functools.lru_cache(maxsize=None)
def _pooling_matrix_np(length: int, output_length: int) -> np.ndarray:
    """(L, out) f32 matrix whose column i averages AdaptiveAvgPool1d window i."""
    w = np.zeros((length, output_length), dtype=np.float32)
    for i in range(output_length):
        start = (i * length) // output_length
        end = -(-((i + 1) * length) // output_length)  # ceil((i+1)*L/out)
        w[start:end, i] = 1.0 / float(end - start)
    return w


# ---------------------------------------------------------------------------
# Tile-size heuristics (keep double-buffered tiles within a conservative
# VMEM budget that fits every generation's scoped default).
# ---------------------------------------------------------------------------
_VMEM_BUDGET_BYTES = 8 << 20  # conservative: fits v5e's 16 MiB scoped default


def _choose_row_tile(m: int, length: int, out: int, itemsize: int) -> int:
    """Tile size along the B*C axis (second-to-last dim: multiple of 8 or full)."""
    per_row = 2 * (length + out) * max(itemsize, 1)  # double-buffered x + out
    tm = int(_VMEM_BUDGET_BYTES // per_row)
    tm = max(8, min(1024, (tm // 8) * 8))
    if m <= tm:
        return m  # single tile along M; block == full dim is always legal
    return tm


def _choose_col_tile(c: int, length: int, out: int, itemsize: int) -> int:
    """Tile size along the channel (lane) axis: multiple of 128 or full."""
    per_col = 2 * (length + out) * max(itemsize, 1)
    tc = int(_VMEM_BUDGET_BYTES // per_col)
    tc = max(128, min(1024, (tc // 128) * 128))
    if c <= tc:
        return c
    return tc


# ---------------------------------------------------------------------------
# Kernels
# ---------------------------------------------------------------------------
def _pool_ncl_kernel(x_ref, w_ref, o_ref):
    # x_ref: (TM, L), w_ref: (L, out) f32, o_ref: (TM, out)
    o_ref[...] = jnp.dot(
        x_ref[...], w_ref[...], preferred_element_type=jnp.float32
    ).astype(o_ref.dtype)


def _pool_nlc_kernel(wt_ref, x_ref, o_ref):
    # wt_ref: (out, L) f32, x_ref: (1, L, TC), o_ref: (1, out, TC)
    o_ref[0] = jnp.dot(
        wt_ref[...], x_ref[0], preferred_element_type=jnp.float32
    ).astype(o_ref.dtype)


# ---------------------------------------------------------------------------
# Wrappers
# ---------------------------------------------------------------------------
def adaptive_avg_pool1d_ncl(x: jnp.ndarray, output_length: int) -> jnp.ndarray:
    """x: (B, C, L) -> (B, C, output_length). Exact AdaptiveAvgPool1d semantics."""
    b, c, length = x.shape
    m = b * c
    w = jnp.asarray(_pooling_matrix_np(length, output_length))  # f32 weights
    x2d = x.reshape(m, length)

    tm = _choose_row_tile(m, length, output_length, jnp.dtype(x.dtype).itemsize)
    grid = (pl.cdiv(m, tm),)

    out2d = pl.pallas_call(
        _pool_ncl_kernel,
        out_shape=jax.ShapeDtypeStruct((m, output_length), x.dtype),
        grid=grid,
        in_specs=[
            pl.BlockSpec((tm, length), lambda i: (i, 0)),          # x tile
            pl.BlockSpec((length, output_length), lambda i: (0, 0)),  # W resident
        ],
        out_specs=pl.BlockSpec((tm, output_length), lambda i: (i, 0)),
        compiler_params=pltpu.CompilerParams(
            dimension_semantics=("parallel",),
        ),
    )(x2d, w)

    return out2d.reshape(b, c, output_length)


def adaptive_avg_pool1d_nlc(x: jnp.ndarray, output_length: int) -> jnp.ndarray:
    """x: (B, L, C) -> (B, output_length, C) with no full-tensor transposes.

    Equivalent to permute(0,2,1) -> AdaptiveAvgPool1d -> permute(0,2,1).
    """
    b, length, c = x.shape
    wt = jnp.asarray(_pooling_matrix_np(length, output_length).T)  # (out, L) f32

    tc = _choose_col_tile(c, length, output_length, jnp.dtype(x.dtype).itemsize)
    grid = (b, pl.cdiv(c, tc))

    out = pl.pallas_call(
        _pool_nlc_kernel,
        out_shape=jax.ShapeDtypeStruct((b, output_length, c), x.dtype),
        grid=grid,
        in_specs=[
            pl.BlockSpec((output_length, length), lambda bi, ci: (0, 0)),  # W^T
            pl.BlockSpec((1, length, tc), lambda bi, ci: (bi, 0, ci)),     # x tile
        ],
        out_specs=pl.BlockSpec((1, output_length, tc), lambda bi, ci: (bi, 0, ci)),
        compiler_params=pltpu.CompilerParams(
            dimension_semantics=("parallel", "parallel"),
        ),
    )(wt, x)

    return out


class Avgpooling:
    """JAX/Pallas port of the PyTorch Avgpooling module (no learnable params)."""

    def __init__(self, outputlength: int, trans: bool = False):
        self.output = outputlength
        self.length = None
        self.trans = trans

    def set_length(self, length):
        self.length = length

    def __call__(self, x: jnp.ndarray) -> jnp.ndarray:
        if self.trans:
            # Input is (B, L, C): pool over L directly, producing (B, out, C).
            # Matches permute -> AdaptiveAvgPool1d -> permute without the two
            # extra HBM transpose passes.
            return adaptive_avg_pool1d_nlc(x, self.output)
        return adaptive_avg_pool1d_ncl(x, self.output)


# ---------------------------------------------------------------------------
# Reference + self-test
# ---------------------------------------------------------------------------
def _reference_adaptive_avg_pool1d(x: np.ndarray, output_length: int) -> np.ndarray:
    b, c, length = x.shape
    out = np.zeros((b, c, output_length), dtype=np.float32)
    for i in range(output_length):
        start = (i * length) // output_length
        end = -(-((i + 1) * length) // output_length)
        out[:, :, i] = x[:, :, start:end].mean(axis=-1)
    return out


if __name__ == "__main__":
    key = jax.random.PRNGKey(0)
    batch, channels, seq = 2, 4, 16
    output_length = 8

    x = jax.random.normal(key, (batch, channels, seq), dtype=jnp.float32)

    # trans=False path: input is (B, C, L)
    module = Avgpooling(output_length, trans=False)
    y = jax.block_until_ready(module(x))

    # trans=True path: input is (B, L, C), output is (B, out, C)
    x_t = jnp.transpose(x, (0, 2, 1))
    module_t = Avgpooling(output_length, trans=True)
    y_t = jax.block_until_ready(module_t(x_t))

    # Correctness check against a pure-numpy reference of AdaptiveAvgPool1d.
    ref = _reference_adaptive_avg_pool1d(np.asarray(x), output_length)
    np.testing.assert_allclose(np.asarray(y), ref, rtol=1e-5, atol=1e-5)
    np.testing.assert_allclose(
        np.asarray(jnp.transpose(y_t, (0, 2, 1))), ref, rtol=1e-5, atol=1e-5
    )

    print("KERNEL_OK")
</pallas_src>

<mosaic_0001>
module attributes {stable_mosaic.version = 11 : i64} {
  func.func @_pool_ncl_kernel(%arg0: i32, %arg1: memref<8x16xf32, #tpu.memory_space<vmem>>, %arg2: memref<16x8xf32, #tpu.memory_space<vmem>>, %arg3: memref<8x8xf32, #tpu.memory_space<vmem>>) attributes {dimension_semantics = [#tpu.dimension_semantics<parallel>], iteration_bounds = array<i64: 1>, scalar_prefetch = 0 : i64, scratch_operands = 0 : i64, tpu.core_type = #tpu.core_type<tc>, window_params = [{transform_indices = @transform_0, window_bounds = array<i64: 8, 16>}, {pipeline_mode = #tpu.pipeline_mode<synchronous>, transform_indices = @transform_1, window_bounds = array<i64: 16, 8>}, {transform_indices = @transform_2, window_bounds = array<i64: 8, 8>}]} {
    %c0 = arith.constant 0 : index
    %c0_0 = arith.constant 0 : index
    %0 = vector.load %arg1[%c0, %c0_0] : memref<8x16xf32, #tpu.memory_space<vmem>>, vector<8x16xf32>
    %c0_1 = arith.constant 0 : index
    %c0_2 = arith.constant 0 : index
    %1 = vector.load %arg2[%c0_1, %c0_2] : memref<16x8xf32, #tpu.memory_space<vmem>>, vector<16x8xf32>
    %cst = arith.constant dense<0.000000e+00> : vector<8x8xf32>
    %2 = tpu.matmul %0, %1, %cst {dimension_numbers = #tpu.dot_dimension_numbers<[1], [0], [0], [1], [0, 0, 1, 1], [], []>} : vector<8x16xf32>, vector<16x8xf32>, vector<8x8xf32> -> vector<8x8xf32>
    %c0_3 = arith.constant 0 : index
    %c0_4 = arith.constant 0 : index
    %3 = vector.load %arg3[%c0_3, %c0_4] : memref<8x8xf32, #tpu.memory_space<vmem>>, vector<8x8xf32>
    tpu.vector_store %arg3[%c0_3, %c0_4], %2 {strides = array<i32>} : memref<8x8xf32, #tpu.memory_space<vmem>>, vector<8x8xf32>,
    return
  }
  func.func @transform_0(%arg0: i32) -> (i32, i32) {
    %c0_i32 = arith.constant 0 : i32
    %c0_i32_0 = arith.constant 0 : i32
    return %arg0, %c0_i32 : i32, i32
  }
  func.func @transform_1(%arg0: i32) -> (i32, i32) {
    %c0_i32 = arith.constant 0 : i32
    %c0_i32_0 = arith.constant 0 : i32
    %c0_i32_1 = arith.constant 0 : i32
    return %c0_i32, %c0_i32_0 : i32, i32
  }
  func.func @transform_2(%arg0: i32) -> (i32, i32) {
    %c0_i32 = arith.constant 0 : i32
    %c0_i32_0 = arith.constant 0 : i32
    return %arg0, %c0_i32 : i32, i32
  }
}

</mosaic_0001>

<bundles_post_ra>
// kernel: tpu_custom_call.1
= control target key start
LH: loop header
LB: loop body
LE: loop exit
PB: predicated region body
PF: predicated region fallthrough
CT: control target
= control target key end

     0   :  { %v147_v2 = vmov 0.0|0.0   ;;  %vm148_vm0 = vmmov 0   ;;  %v149_v4 = vmov 0.0   ;;  %s187_s0 = inlined_call_operand.vmem [shape: f32[8,16], index: 0, kind: input, shape index: {}]   ;;  %s188_s1 = inlined_call_operand.vmem [shape: f32[16,8], index: 1, kind: input, shape index: {}]   ;;  %s189_s2 = inlined_call_operand.hbm [shape: f32[8,8], index: 2, kind: output, shape index: {}]  }
   0x1   :  { %v13_v0 = vld [vmem:[%s188_s1] sm:$0xff]  ;;  %v14_v1 = vld [vmem:[%s188_s1 + $0x8] sm:$0xff]  ;;  %116 = vmatprep.subr.bf16.mxu0 %v147_v2  ;;  %113 = vmatprep.mubr.msk.f32.mxu0 %vm148_vm0, %v149_v4 }
   0x2   :  { %v117_v3 = vpack.c.bf16 %v14_v1, %v13_v0 }
   0x3   :  { %7 = vsyncpa [#allocation3], 0  ;;  %v12_v5 = vld [vmem:[%s187_s0] sm:$0xff]  ;;  %vm15_vm1 = vcmask 130048   ;;  %s150_s15 = smov [#allocation2]   ;;  %vm89_vm2 = vcmask 64512  }
   0x4   :  { %118 = vmatpush3.bf16.msra.mxu0 %v117_v3  ;;  %s97_s16 = sshll.u32 %s150_s15, 4  ;;  %s98_s16 = int_to_ptr.vmem [resolvable:$true] %s97_s16 }
   0x5   :  { %s123_s1 = scalar_lea.vmem %s98_s16, 128  ;;  %p128_p1 = scmp.lt.s32.totalorder %s98_s16, %s98_s16 }
   0x6   :  { %p124_p0 = scmp.ne.s32.totalorder %s98_s16, %s123_s1  ;;  %p129_p2 = scmp.lt.s32.totalorder %s123_s1, %s123_s1 }
   0x7   :  { %114 = vmatmul.mubr.msk.f32.vlgmr.msra.gmra.mrb[0].mxu0 %vm15_vm1, %v12_v5 }
   0x8   :  { %p130_p3 = por %p129_p2, %p128_p1 }
   0xa   :  { %p131_p4 = pnand %p130_p3, %p124_p0 }
  0xda   :  { %v85_v6 = vpop.f32.mrb[0].mxu0 }
  0xdb   :  { %90 = vst.msk [vmem:[#allocation2] sm:$0xff] %vm89_vm2, %v85_v6  ;;  %v115_v7 = vpop.f32.mrb[1].mxu0 }
  0xdc   :  { %134 = shalt.err (!%p131_p4)
}
  0xdd   :  { %s135_s0 = scalar_lea.hbm %s189_s2, 128 }
  0xde   :  { %p136_p5 = scmp.ne.s32.totalorder %s189_s2, %s135_s0  ;;  %p139_p6 = scmp.lt.u32.totalorder %s135_s0, %s189_s2 }
  0xe0   :  { %p141_p7 = pnand %p139_p6, %p136_p5 }
  0xe2   :  { %144 = shalt.err (!%p141_p7)
}
  0xe3   :  { %100 = dma.vmem_to_hbm [thread:$0]  %s98_s16, 128, %s189_s2, [#allocation3]  }
  0xe4   :  { %145 = dma.done.wait [#allocation3], 128  }
  0xe5   :  { %146 = vsyncadd [#allocation3], 4294967168 }
  0xe6   :  { %104 = vsyncpa [#allocation3], 1 }

</bundles_post_ra>
